<compile_context>
chip_gen: v6e
topology: v6e:2x2x1
jax: 0.10.0
libtpu: 0.0.40
codegen_flags: <defaults>
</compile_context>

<pallas_src>
import functools

import jax
import jax.numpy as jnp
from jax import lax
from jax.experimental import pallas as pl
from jax.experimental.pallas import tpu as pltpu


# ---------------------------------------------------------------------------
# Kernel
# ---------------------------------------------------------------------------
def adain_kernel(gb_ref, x_ref, o_ref, *, eps, inv_hw):
    """Blocks: gb -> (TR, 2) f32;  x/o -> (TR, HW_pad) in x.dtype."""
    x = x_ref[...].astype(jnp.float32)                       # (TR, HWp), f32 math
    s1 = jnp.sum(x, axis=-1, keepdims=True)                  # (TR, 1)
    s2 = jnp.sum(x * x, axis=-1, keepdims=True)              # (TR, 1)
    mean = s1 * inv_hw
    var = jnp.maximum(s2 * inv_hw - mean * mean, 0.0)        # biased var (InstanceNorm2d)
    gamma = gb_ref[:, 0:1]
    beta = gb_ref[:, 1:2]
    scale = (1.0 + gamma) * lax.rsqrt(var + eps)             # (TR, 1)
    shift = beta - mean * scale                              # (TR, 1)
    # out = (x - mean) * scale + beta, re-associated so no centered (TR, HWp)
    # temporary has to stay live across the reduction.
    o_ref[...] = (x * scale + shift).astype(o_ref.dtype)


# ---------------------------------------------------------------------------
# VMEM sizing (generation-aware)
# ---------------------------------------------------------------------------
def _vmem_capacity_bytes():
    try:
        return int(pltpu.get_tpu_info().vmem_capacity_bytes)
    except Exception:
        return 64 * 1024 * 1024          # conservative: v7x per-TC VMEM


def _vmem_limit_bytes():
    cap = _vmem_capacity_bytes()
    return (cap * 7) // 10               # leave headroom for Mosaic scratch


def _choose_row_tile(nc, hw_pad, itemsize, sublane):
    """Row tile targeting a few-MiB (TR, HW_pad) block.

    The kernel is HBM-bandwidth bound; ~2-8 MiB blocks already saturate the
    roofline while giving many grid steps for pipelining and trivially fitting
    v7x's 64 MiB VMEM (4 pipelined x/out buffers + in-kernel f32 temps stay
    well under ~40% of capacity).
    """
    cap = _vmem_capacity_bytes()
    per_block = min(8 << 20, cap // 16)
    rows = per_block // max(1, hw_pad * itemsize)
    if rows >= nc:
        return nc                         # full extent: always layout-legal
    rows = (rows // sublane) * sublane
    # TODO(synk): if even a (sublane, HW_pad) block exceeds the budget (very
    # large feature maps, esp. on v7x), add a spatial "arbitrary" grid axis
    # with sum/sumsq VMEM scratch and pl.when init/finalize instead of
    # falling back to the minimum tile here.
    return max(sublane, rows)


# ---------------------------------------------------------------------------
# Wrapper
# ---------------------------------------------------------------------------
def adain_forward(x, s, w_fc, b_fc, *, eps=1e-5):
    """x: (N, C, H, W), s: (N, S), w_fc: (2C, S), b_fc: (2C,)."""
    N, C, H, W = x.shape
    HW = H * W
    NC = N * C
    out_dtype = x.dtype
    itemsize = jnp.dtype(out_dtype).itemsize

    # Style FC hoisted to XLA (tiny mat-vec).  Pack gamma/beta into a single
    # (N*C, 2) array so the kernel gets one small DMA per grid step.
    h = (s @ w_fc.T + b_fc).astype(jnp.float32)              # (N, 2C)
    gamma = h[:, :C].reshape(NC, 1)
    beta = h[:, C:].reshape(NC, 1)
    gb = jnp.concatenate([gamma, beta], axis=-1)             # (N*C, 2) f32

    # Lane-dense spatial layout: pad HW up to a multiple of 128.  Zero padding
    # is exact because the stats are sums divided by the true HW.
    HWp = ((HW + 127) // 128) * 128
    x_flat = x.reshape(NC, HW)
    if HWp != HW:
        x_flat = jnp.pad(x_flat, ((0, 0), (0, HWp - HW)))

    sublane = max(8, 32 // itemsize)     # 8 for f32, 16 for bf16, 32 for int8
    TR = _choose_row_tile(NC, HWp, itemsize, sublane)

    kernel = functools.partial(adain_kernel, eps=eps, inv_hw=1.0 / HW)
    out_flat = pl.pallas_call(
        kernel,
        out_shape=jax.ShapeDtypeStruct((NC, HWp), out_dtype),
        grid_spec=pltpu.PrefetchScalarGridSpec(
            num_scalar_prefetch=0,
            grid=(pl.cdiv(NC, TR),),
            in_specs=[
                pl.BlockSpec((TR, 2), lambda r: (r, 0)),      # packed gamma/beta
                # If a trace on v5e/v6e shows exposed DMA at block boundaries,
                # add pipeline_mode=pl.Buffered(3) here (VMEM headroom exists).
                pl.BlockSpec((TR, HWp), lambda r: (r, 0)),    # x
            ],
            out_specs=pl.BlockSpec((TR, HWp), lambda r: (r, 0)),
        ),
        compiler_params=pltpu.CompilerParams(
            dimension_semantics=("parallel",),
            vmem_limit_bytes=_vmem_limit_bytes(),
        ),
    )(gb, x_flat)

    if HWp != HW:
        out_flat = out_flat[:, :HW]
    return out_flat.reshape(N, C, H, W)


# ---------------------------------------------------------------------------
# Pure-JAX reference (mirrors the PyTorch module)
# ---------------------------------------------------------------------------
def adain_reference(x, s, w_fc, b_fc, *, eps=1e-5):
    N, C, H, W = x.shape
    h = s @ w_fc.T + b_fc                                    # (N, 2C)
    gamma = h[:, :C].reshape(N, C, 1, 1)
    beta = h[:, C:].reshape(N, C, 1, 1)
    mean = jnp.mean(x, axis=(2, 3), keepdims=True)
    var = jnp.mean((x - mean) ** 2, axis=(2, 3), keepdims=True)
    norm = (x - mean) / jnp.sqrt(var + eps)
    return (1.0 + gamma) * norm + beta


if __name__ == "__main__":
    # Small shapes: batch=2, num_features=4, spatial=16x16, style_dim=8.
    N, C, H, W = 2, 4, 16, 16
    style_dim = 8

    key = jax.random.PRNGKey(0)
    kx, ks, kw, kb = jax.random.split(key, 4)

    x = jax.random.normal(kx, (N, C, H, W), dtype=jnp.float32)
    s = jax.random.normal(ks, (N, style_dim), dtype=jnp.float32)

    # Deterministic nn.Linear-style init: U(-1/sqrt(fan_in), 1/sqrt(fan_in)).
    bound = 1.0 / (style_dim ** 0.5)
    w_fc = jax.random.uniform(kw, (2 * C, style_dim), jnp.float32, -bound, bound)
    b_fc = jax.random.uniform(kb, (2 * C,), jnp.float32, -bound, bound)

    out = adain_forward(x, s, w_fc, b_fc)
    out = jax.block_until_ready(out)

    ref = adain_reference(x, s, w_fc, b_fc)
    assert out.shape == (N, C, H, W)
    assert out.dtype == x.dtype
    assert jnp.allclose(out, ref, atol=3e-5, rtol=1e-5), "mismatch vs reference"

    print("KERNEL_OK")
</pallas_src>

<mosaic_0001>
module attributes {stable_mosaic.version = 11 : i64} {
  func.func @adain_kernel(%arg0: i32, %arg1: memref<8x2xf32, #tpu.memory_space<vmem>>, %arg2: memref<8x256xf32, #tpu.memory_space<vmem>>, %arg3: memref<8x256xf32, #tpu.memory_space<vmem>>) attributes {dimension_semantics = [#tpu.dimension_semantics<parallel>], iteration_bounds = array<i64: 1>, scalar_prefetch = 0 : i64, scratch_operands = 0 : i64, tpu.core_type = #tpu.core_type<tc>, window_params = [{transform_indices = @transform_0, window_bounds = array<i64: 8, 2>}, {transform_indices = @transform_1, window_bounds = array<i64: 8, 256>}, {transform_indices = @transform_2, window_bounds = array<i64: 8, 256>}]} {
    %c0 = arith.constant 0 : index
    %c0_0 = arith.constant 0 : index
    %0 = vector.load %arg2[%c0, %c0_0] : memref<8x256xf32, #tpu.memory_space<vmem>>, vector<8x256xf32>
    %cst = arith.constant dense<0.000000e+00> : vector<8xf32>
    %1 = vector.multi_reduction <add>, %0, %cst [1] : vector<8x256xf32> to vector<8xf32>
    %2 = vector.shape_cast %1 : vector<8xf32> to vector<8x1xf32>
    %3 = arith.mulf %0, %0 : vector<8x256xf32>
    %cst_1 = arith.constant dense<0.000000e+00> : vector<8xf32>
    %4 = vector.multi_reduction <add>, %3, %cst_1 [1] : vector<8x256xf32> to vector<8xf32>
    %5 = vector.shape_cast %4 : vector<8xf32> to vector<8x1xf32>
    %cst_2 = arith.constant 3.906250e-03 : f32
    %6 = vector.broadcast %cst_2 : f32 to vector<8x1xf32>
    %7 = arith.mulf %2, %6 : vector<8x1xf32>
    %cst_3 = arith.constant 3.906250e-03 : f32
    %8 = vector.broadcast %cst_3 : f32 to vector<8x1xf32>
    %9 = arith.mulf %5, %8 : vector<8x1xf32>
    %10 = arith.mulf %7, %7 : vector<8x1xf32>
    %11 = arith.subf %9, %10 : vector<8x1xf32>
    %cst_4 = arith.constant 0.000000e+00 : f32
    %12 = vector.broadcast %cst_4 : f32 to vector<8x1xf32>
    %13 = arith.maximumf %11, %12 : vector<8x1xf32>
    %c0_5 = arith.constant 0 : index
    %c0_6 = arith.constant 0 : index
    %14 = vector.load %arg1[%c0_5, %c0_6] : memref<8x2xf32, #tpu.memory_space<vmem>>, vector<8x1xf32>
    %c0_7 = arith.constant 0 : index
    %c1 = arith.constant 1 : index
    %15 = vector.load %arg1[%c0_7, %c1] : memref<8x2xf32, #tpu.memory_space<vmem>>, vector<8x1xf32>
    %cst_8 = arith.constant 1.000000e+00 : f32
    %16 = vector.broadcast %cst_8 : f32 to vector<8x1xf32>
    %17 = arith.addf %16, %14 : vector<8x1xf32>
    %cst_9 = arith.constant 9.99999974E-6 : f32
    %18 = vector.broadcast %cst_9 : f32 to vector<8x1xf32>
    %19 = arith.addf %13, %18 : vector<8x1xf32>
    %20 = math.rsqrt %19 : vector<8x1xf32>
    %21 = arith.mulf %17, %20 : vector<8x1xf32>
    %22 = arith.mulf %7, %21 : vector<8x1xf32>
    %23 = arith.subf %15, %22 : vector<8x1xf32>
    %24 = vector.broadcast %21 : vector<8x1xf32> to vector<8x256xf32>
    %25 = arith.mulf %0, %24 : vector<8x256xf32>
    %26 = vector.broadcast %23 : vector<8x1xf32> to vector<8x256xf32>
    %27 = arith.addf %25, %26 : vector<8x256xf32>
    %c0_10 = arith.constant 0 : index
    %c0_11 = arith.constant 0 : index
    %28 = vector.load %arg3[%c0_10, %c0_11] : memref<8x256xf32, #tpu.memory_space<vmem>>, vector<8x256xf32>
    tpu.vector_store %arg3[%c0_10, %c0_11], %27 {strides = array<i32>} : memref<8x256xf32, #tpu.memory_space<vmem>>, vector<8x256xf32>,
    return
  }
  func.func @transform_0(%arg0: i32) -> (i32, i32) {
    %c0_i32 = arith.constant 0 : i32
    %c0_i32_0 = arith.constant 0 : i32
    return %arg0, %c0_i32 : i32, i32
  }
  func.func @transform_1(%arg0: i32) -> (i32, i32) {
    %c0_i32 = arith.constant 0 : i32
    %c0_i32_0 = arith.constant 0 : i32
    return %arg0, %c0_i32 : i32, i32
  }
  func.func @transform_2(%arg0: i32) -> (i32, i32) {
    %c0_i32 = arith.constant 0 : i32
    %c0_i32_0 = arith.constant 0 : i32
    return %arg0, %c0_i32 : i32, i32
  }
}

</mosaic_0001>

<bundles_post_ra>
// kernel: tpu_custom_call.1
= control target key start
LH: loop header
LB: loop body
LE: loop exit
PB: predicated region body
PF: predicated region fallthrough
CT: control target
= control target key end

     0   :  { %7 = vsyncpa [#allocation3], 0  ;;  %s163_s0 = inlined_call_operand.vmem [shape: f32[8,2], index: 0, kind: input, shape index: {}]   ;;  %s164_s1 = inlined_call_operand.hbm [shape: f32[8,256], index: 1, kind: input, shape index: {}]   ;;  %s165_s2 = inlined_call_operand.hbm [shape: f32[8,256], index: 2, kind: output, shape index: {}]  }
   0x1   :  { %8 = vsyncpa [#allocation4], 0  ;;  %s134_s9 = smov [#allocation2]  }
   0x2   :  { %s17_s10 = sshll.u32 %s134_s9, 4  ;;  %s18_s10 = int_to_ptr.vmem [resolvable:$true] %s17_s10 }
   0x3   :  { %s98_s11 = scalar_lea.vmem %s18_s10, 256  ;;  %p103_p1 = scmp.lt.s32.totalorder %s18_s10, %s18_s10 }
   0x4   :  { %p99_p0 = scmp.ne.s32.totalorder %s18_s10, %s98_s11  ;;  %p104_p2 = scmp.lt.s32.totalorder %s98_s11, %s98_s11 }
   0x6   :  { %p105_p3 = por %p104_p2, %p103_p1 }
   0x8   :  { %p106_p4 = pnand %p105_p3, %p99_p0 }
   0xa   :  { %109 = shalt.err (!%p106_p4)
}
   0xb   :  { %20 = dma.hbm_to_vmem [thread:$0]  %s164_s1, 256, %s18_s10, [#allocation3]  }
   0xc   :  { %130 = dma.done.wait [#allocation3], 256  }
   0xd   :  { %131 = vsyncadd [#allocation3], 4294967040  ;;  %v24_v0 = vld [vmem:[#allocation2] sm:$0xff]  ;;  %v25_v1 = vld [vmem:[#allocation2 + $0x8] sm:$0xff]  ;;  %v135_v6 = vmov 0   ;;  %v136_v15 = vmov 1  }
   0xe   :  { %v26_v2 = vadd.f32 %v25_v1, %v24_v0  ;;  %v29_v3 = vmul.f32 %v24_v0, %v24_v0  ;;  %v30_v4 = vmul.f32 %v25_v1, %v25_v1  ;;  %86 = vset.pattern.permute.xlu1 %v135_v6  ;;  %87 = vset.pattern.permute.xlu0 %v136_v15  ;;  %v39_v16 = vld [vmem:[%s163_s0] sm:$0xff]  ;;  %s137_s15 = smov 1   ;;  %s138_s16 = smov [#allocation5]  }
   0xf   :  { %v40_v17 = vadd.f32 1.0, %v39_v16  ;;  %s72_s17 = sshll.u32 %s138_s16, 4  ;;  %s73_s17 = int_to_ptr.vmem [resolvable:$true] %s72_s17 }
  0x10   :  { %27 = vadd.xlane.f32.xlu0 %v26_v2  ;;  %v31_v5 = vadd.f32 %v30_v4, %v29_v3  ;;  %s110_s0 = scalar_lea.vmem %s73_s17, 256  ;;  %p115_p6 = scmp.lt.s32.totalorder %s73_s17, %s73_s17 }
  0x11   :  { %p111_p5 = scmp.ne.s32.totalorder %s73_s17, %s110_s0  ;;  %p116_p7 = scmp.lt.s32.totalorder %s110_s0, %s110_s0 }
  0x13   :  { %p117_p8 = por %p116_p7, %p115_p6 }
  0x14   :  { %32 = vadd.xlane.f32.xlu0 %v31_v5 }
  0x15   :  { %p118_p9 = pnand %p117_p8, %p111_p5 }
  0x99   :  { %v28_v7 = vpop.xlane.xlu0 %27 }
  0x9a   :  { %v34_v8 = vmul.f32 0.00390625, %v28_v7 }
  0x9c   :  { %v36_v10 = vmul.f32 %v34_v8, %v34_v8 }
  0x9d   :  { %v33_v9 = vpop.xlane.xlu0 %32 }
  0x9e   :  { %v35_v11 = vmul.f32 0.00390625, %v33_v9 }
  0xa0   :  { %v37_v12 = vsub.f32 %v35_v11, %v36_v10 }
  0xa2   :  { %v38_v13 = vmax.f32 %v37_v12, 0.0 }
  0xa4   :  { %v41_v14 = vadd.f32 1e-05, %v38_v13 }
  0xa6   :  { %88 = vrsqrt.f32 %v41_v14 }
  0xb3   :  { %v89_v18 = vpop.eup %88 }
  0xb4   :  { %v43_v19 = vmul.f32 %v89_v18, %v40_v17 }
  0xb6   :  { %v44_v20 = vmul.f32 %v43_v19, %v34_v8 }
  0xb8   :  { %46 = vrot.lane.b32.xlu1 %v44_v20, %s137_s15 }
  0xbc   :  { %52 = vperm.xlu1 %86, %v43_v19  }
 0x12a   :  { %v47_v21 = vpop.permute.xlu1 %46 }
 0x12b   :  { %v49_v22 = vsub.f32 %v39_v16, %v47_v21 }
 0x12d   :  { %59 = vperm.xlu0 %87, %v49_v22  }
 0x137   :  { %v53_v23 = vpop.permute.xlu1 %52 }
 0x138   :  { %v55_v24 = vmul.f32 %v53_v23, %v24_v0  ;;  %v56_v25 = vmul.f32 %v53_v23, %v25_v1 }
 0x1a8   :  { %v60_v26 = vpop.permute.xlu0 %59 }
 0x1a9   :  { %v62_v27 = vadd.f32 %v60_v26, %v55_v24  ;;  %v63_v28 = vadd.f32 %v60_v26, %v56_v25 }
 0x1ab   :  { %64 = vst [vmem:[#allocation5] sm:$0xff] %v62_v27  ;;  %65 = vst [vmem:[#allocation5 + $0x8] sm:$0xff] %v63_v28 }
 0x1ac   :  { %121 = shalt.err (!%p118_p9)
}
 0x1ad   :  { %75 = dma.vmem_to_hbm [thread:$0]  %s73_s17, 256, %s165_s2, [#allocation4]  }
 0x1ae   :  { %132 = dma.done.wait [#allocation4], 256  }
 0x1af   :  { %133 = vsyncadd [#allocation4], 4294967040 }
 0x1b0   :  { %79 = vsyncpa [#allocation3], 1 }
 0x1b1   :  { %80 = vsyncpa [#allocation4], 1 }

</bundles_post_ra>
